<compile_context>
chip_gen: v7x
topology: tpu7x:2x2x1
jax: 0.10.0
libtpu: 0.0.40
codegen_flags: <defaults>
</compile_context>

<pallas_src>
import functools

import jax
import jax.numpy as jnp
from jax.experimental import pallas as pl
from jax.experimental.pallas import tpu as pltpu


# ---------------------------------------------------------------------------
# Pass 1: streaming global-average-pool + excitation MLP -> channel gates
# ---------------------------------------------------------------------------
def _squeeze_excite_kernel(x_ref, w1_ref, w2_ref, gate_ref, acc_ref, *, inv_hw):
    # x_ref:    (1, C, tHW)  current spatial chunk of one batch item (x dtype)
    # w1_ref:   (C, Ch)      first Linear weight, pre-transposed, f32
    # w2_ref:   (Ch, C)      second Linear weight, pre-transposed, f32
    # gate_ref: (1, C, 1)    f32 gate (written only on the last chunk)
    # acc_ref:  (1, C)       f32 running spatial sum (VMEM scratch)
    k = pl.program_id(1)

    @pl.when(k == 0)
    def _():
        acc_ref[...] = jnp.zeros_like(acc_ref)

    # Cast per tile only: the f32 footprint is one chunk, never all of x.
    acc_ref[...] += jnp.sum(x_ref[...].astype(jnp.float32), axis=-1)

    @pl.when(k == pl.num_programs(1) - 1)
    def _():
        pooled = acc_ref[...] * inv_hw                                   # (1, C)
        h = jnp.dot(pooled, w1_ref[...],
                    preferred_element_type=jnp.float32)                  # (1, Ch)
        h = jnp.maximum(h, 0.0)
        s = jnp.dot(h, w2_ref[...],
                    preferred_element_type=jnp.float32)                  # (1, C)
        gate_ref[...] = jax.nn.sigmoid(s)[:, :, None]


# ---------------------------------------------------------------------------
# Pass 2: tiled, lane-dense broadcast scale:  out = x * gate
# ---------------------------------------------------------------------------
def _scale_kernel(x_ref, gate_ref, o_ref):
    # x_ref: (1, C, tHW); gate_ref: (1, C, 1); o_ref: (1, C, tHW)
    g = gate_ref[...].astype(o_ref.dtype)          # gate stays f32 until here
    o_ref[...] = x_ref[...] * g                    # multiply in input dtype


def _pick_hw_tile(hw, bytes_per_hw_elem, budget_bytes):
    """Largest HW tile that is a multiple of 128, divides HW, fits the budget."""
    if hw % 128 != 0:
        # TODO(synk): non-128-multiple HW falls back to a single full-extent
        # block along HW (fine for typical SE spatial sizes).
        return hw
    max_elems = max(128, (budget_bytes // max(1, bytes_per_hw_elem)) // 128 * 128)
    t = min(hw, max_elems)
    while hw % t != 0:
        t -= 128
    return t


def se_block(x, w1, w2):
    """SEBlock forward matching the PyTorch module.

    x : (N, C, H, W)  NCHW input
    w1: (C // r, C)   first nn.Linear weight (PyTorch (out, in) layout, no bias)
    w2: (C, C // r)   second nn.Linear weight
    """
    N, C, H, W = x.shape
    hidden = w1.shape[0]
    HW = H * W
    itemsize = jnp.dtype(x.dtype).itemsize

    x3 = x.reshape(N, C, HW)
    w1t = w1.T.astype(jnp.float32)  # (C, hidden)
    w2t = w2.T.astype(jnp.float32)  # (hidden, C)

    # ---- pass 1: streaming squeeze + tiny excitation MLP -> (N, C, 1) gates
    # Only the x chunk is double-buffered: 2 * budget stays well under limits.
    t_sq = _pick_hw_tile(HW, C * itemsize, budget_bytes=4 * 1024 * 1024)
    gates = pl.pallas_call(
        functools.partial(_squeeze_excite_kernel, inv_hw=1.0 / HW),
        out_shape=jax.ShapeDtypeStruct((N, C, 1), jnp.float32),
        grid_spec=pltpu.PrefetchScalarGridSpec(
            num_scalar_prefetch=0,
            grid=(N, HW // t_sq),
            in_specs=[
                pl.BlockSpec((1, C, t_sq), lambda n, k: (n, 0, k)),
                pl.BlockSpec((C, hidden), lambda n, k: (0, 0)),
                pl.BlockSpec((hidden, C), lambda n, k: (0, 0)),
            ],
            out_specs=pl.BlockSpec((1, C, 1), lambda n, k: (n, 0, 0)),
            scratch_shapes=[pltpu.VMEM((1, C), jnp.float32)],
        ),
        compiler_params=pltpu.CompilerParams(
            dimension_semantics=("parallel", "arbitrary"),
        ),
        cost_estimate=pl.CostEstimate(
            flops=N * C * HW + 4 * N * C * hidden,
            transcendentals=N * C,
            bytes_accessed=N * C * HW * itemsize + 2 * C * hidden * 4 + N * C * 4,
        ),
    )(x3, w1t, w2t)

    # ---- pass 2: tiled, pipelined broadcast scale (lane-dense output tiles)
    # Both the x chunk and the out chunk are double-buffered (4 * budget total).
    t_sc = _pick_hw_tile(HW, C * itemsize, budget_bytes=2 * 1024 * 1024)
    out3 = pl.pallas_call(
        _scale_kernel,
        out_shape=jax.ShapeDtypeStruct((N, C, HW), x.dtype),
        grid_spec=pltpu.PrefetchScalarGridSpec(
            num_scalar_prefetch=0,
            grid=(N, HW // t_sc),
            in_specs=[
                pl.BlockSpec((1, C, t_sc), lambda n, k: (n, 0, k)),
                pl.BlockSpec((1, C, 1), lambda n, k: (n, 0, 0)),
            ],
            out_specs=pl.BlockSpec((1, C, t_sc), lambda n, k: (n, 0, k)),
        ),
        compiler_params=pltpu.CompilerParams(
            dimension_semantics=("parallel", "parallel"),
        ),
        cost_estimate=pl.CostEstimate(
            flops=N * C * HW,
            transcendentals=0,
            bytes_accessed=2 * N * C * HW * itemsize + N * C * 4,
        ),
    )(x3, gates)

    return out3.reshape(N, C, H, W)


def se_block_reference(x, w1, w2):
    """Pure-JAX reference matching the PyTorch module."""
    y = jnp.mean(x, axis=(2, 3))                  # (N, C)
    y = jnp.maximum(y @ w1.T, 0.0)                # (N, C//r)
    y = jax.nn.sigmoid(y @ w2.T)                  # (N, C)
    return x * y[:, :, None, None]


if __name__ == "__main__":
    # Small, SE-consistent shapes: r=16 requires C >= 16; pick C=32 -> hidden=2.
    N, C, H, W = 2, 32, 16, 16
    r = 16
    hidden = C // r

    key = jax.random.PRNGKey(0)
    kx, k1, k2 = jax.random.split(key, 3)
    x = jax.random.normal(kx, (N, C, H, W), dtype=jnp.float32)
    # Deterministic params (shapes from nn.Linear(in, out, bias=False)):
    w1 = jax.random.normal(k1, (hidden, C), dtype=jnp.float32) * 0.1
    w2 = jax.random.normal(k2, (C, hidden), dtype=jnp.float32) * 0.1

    out = se_block(x, w1, w2)
    out = jax.block_until_ready(out)

    ref = se_block_reference(x, w1, w2)
    assert out.shape == (N, C, H, W)
    assert jnp.allclose(out, ref, atol=1e-5, rtol=1e-5)

    print("KERNEL_OK")
</pallas_src>

<mosaic_0001>
module attributes {stable_mosaic.version = 11 : i64} {
  func.func @_squeeze_excite_kernel(%arg0: i32, %arg1: i32, %arg2: memref<1x32x256xf32, #tpu.memory_space<vmem>>, %arg3: memref<32x2xf32, #tpu.memory_space<vmem>>, %arg4: memref<2x32xf32, #tpu.memory_space<vmem>>, %arg5: memref<1x32x1xf32, #tpu.memory_space<vmem>>, %arg6: memref<1x32xf32, #tpu.memory_space<vmem>>) attributes {dimension_semantics = [#tpu.dimension_semantics<parallel>, #tpu.dimension_semantics<arbitrary>], iteration_bounds = array<i64: 2, 1>, scalar_prefetch = 0 : i64, scratch_operands = 1 : i64, tpu.core_type = #tpu.core_type<tc>, window_params = [{transform_indices = @transform_0, window_bounds = array<i64: 1, 32, 256>}, {pipeline_mode = #tpu.pipeline_mode<synchronous>, transform_indices = @transform_1, window_bounds = array<i64: 32, 2>}, {pipeline_mode = #tpu.pipeline_mode<synchronous>, transform_indices = @transform_2, window_bounds = array<i64: 2, 32>}, {transform_indices = @transform_3, window_bounds = array<i64: 1, 32, 1>}]} {
    %c0_i32 = arith.constant 0 : i32
    %0 = arith.cmpi eq, %arg1, %c0_i32 : i32
    %1 = arith.extui %0 : i1 to i32
    %c0_i32_0 = arith.constant 0 : i32
    %2 = arith.cmpi ne, %1, %c0_i32_0 : i32
    scf.if %2 {
      %cst_9 = arith.constant 0.000000e+00 : f32
      %11 = vector.broadcast %cst_9 : f32 to vector<1x32xf32>
      %c0_10 = arith.constant 0 : index
      %c0_11 = arith.constant 0 : index
      %12 = vector.load %arg6[%c0_10, %c0_11] : memref<1x32xf32, #tpu.memory_space<vmem>>, vector<1x32xf32>
      tpu.vector_store %arg6[%c0_10, %c0_11], %11 {strides = array<i32>} : memref<1x32xf32, #tpu.memory_space<vmem>>, vector<1x32xf32>,
    } else {
    }
    %c0 = arith.constant 0 : index
    %c0_1 = arith.constant 0 : index
    %3 = vector.load %arg6[%c0, %c0_1] : memref<1x32xf32, #tpu.memory_space<vmem>>, vector<1x32xf32>
    %c0_2 = arith.constant 0 : index
    %c0_3 = arith.constant 0 : index
    %c0_4 = arith.constant 0 : index
    %4 = vector.load %arg2[%c0_2, %c0_3, %c0_4] : memref<1x32x256xf32, #tpu.memory_space<vmem>>, vector<1x32x256xf32>
    %cst = arith.constant dense<0.000000e+00> : vector<1x32xf32>
    %5 = vector.multi_reduction <add>, %4, %cst [2] : vector<1x32x256xf32> to vector<1x32xf32>
    %6 = arith.addf %3, %5 : vector<1x32xf32>
    %c0_5 = arith.constant 0 : index
    %c0_6 = arith.constant 0 : index
    %7 = vector.load %arg6[%c0_5, %c0_6] : memref<1x32xf32, #tpu.memory_space<vmem>>, vector<1x32xf32>
    tpu.vector_store %arg6[%c0_5, %c0_6], %6 {strides = array<i32>} : memref<1x32xf32, #tpu.memory_space<vmem>>, vector<1x32xf32>,
    %c0_i32_7 = arith.constant 0 : i32
    %8 = arith.cmpi eq, %arg1, %c0_i32_7 : i32
    %9 = arith.extui %8 : i1 to i32
    %c0_i32_8 = arith.constant 0 : i32
    %10 = arith.cmpi ne, %9, %c0_i32_8 : i32
    scf.if %10 {
      %c0_9 = arith.constant 0 : index
      %c0_10 = arith.constant 0 : index
      %11 = vector.load %arg6[%c0_9, %c0_10] : memref<1x32xf32, #tpu.memory_space<vmem>>, vector<1x32xf32>
      %cst_11 = arith.constant 3.906250e-03 : f32
      %12 = vector.broadcast %cst_11 : f32 to vector<1x32xf32>
      %13 = arith.mulf %11, %12 : vector<1x32xf32>
      %c0_12 = arith.constant 0 : index
      %c0_13 = arith.constant 0 : index
      %14 = vector.load %arg3[%c0_12, %c0_13] : memref<32x2xf32, #tpu.memory_space<vmem>>, vector<32x2xf32>
      %cst_14 = arith.constant dense<0.000000e+00> : vector<1x2xf32>
      %15 = tpu.matmul %13, %14, %cst_14 {dimension_numbers = #tpu.dot_dimension_numbers<[1], [0], [0], [1], [0, 0, 1, 1], [], []>} : vector<1x32xf32>, vector<32x2xf32>, vector<1x2xf32> -> vector<1x2xf32>
      %cst_15 = arith.constant 0.000000e+00 : f32
      %16 = vector.broadcast %cst_15 : f32 to vector<1x2xf32>
      %17 = arith.maximumf %15, %16 : vector<1x2xf32>
      %c0_16 = arith.constant 0 : index
      %c0_17 = arith.constant 0 : index
      %18 = vector.load %arg4[%c0_16, %c0_17] : memref<2x32xf32, #tpu.memory_space<vmem>>, vector<2x32xf32>
      %cst_18 = arith.constant dense<0.000000e+00> : vector<1x32xf32>
      %19 = tpu.matmul %17, %18, %cst_18 {dimension_numbers = #tpu.dot_dimension_numbers<[1], [0], [0], [1], [0, 0, 1, 1], [], []>} : vector<1x2xf32>, vector<2x32xf32>, vector<1x32xf32> -> vector<1x32xf32>
      %20 = arith.negf %19 : vector<1x32xf32>
      %21 = math.exp %20 : vector<1x32xf32>
      %cst_19 = arith.constant 1.000000e+00 : f32
      %22 = vector.broadcast %cst_19 : f32 to vector<1x32xf32>
      %23 = arith.addf %22, %21 : vector<1x32xf32>
      %24 = arith.divf %22, %23 : vector<1x32xf32>
      %25 = vector.shape_cast %24 : vector<1x32xf32> to vector<1x32x1xf32>
      %c0_20 = arith.constant 0 : index
      %c0_21 = arith.constant 0 : index
      %c0_22 = arith.constant 0 : index
      %26 = vector.load %arg5[%c0_20, %c0_21, %c0_22] : memref<1x32x1xf32, #tpu.memory_space<vmem>>, vector<1x32x1xf32>
      tpu.vector_store %arg5[%c0_20, %c0_21, %c0_22], %25 {strides = array<i32>} : memref<1x32x1xf32, #tpu.memory_space<vmem>>, vector<1x32x1xf32>,
    } else {
    }
    return
  }
  func.func @transform_0(%arg0: i32, %arg1: i32) -> (i32, i32, i32) {
    %c0_i32 = arith.constant 0 : i32
    %c0_i32_0 = arith.constant 0 : i32
    return %arg0, %c0_i32, %arg1 : i32, i32, i32
  }
  func.func @transform_1(%arg0: i32, %arg1: i32) -> (i32, i32) {
    %c0_i32 = arith.constant 0 : i32
    %c0_i32_0 = arith.constant 0 : i32
    %c0_i32_1 = arith.constant 0 : i32
    return %c0_i32, %c0_i32_0 : i32, i32
  }
  func.func @transform_2(%arg0: i32, %arg1: i32) -> (i32, i32) {
    %c0_i32 = arith.constant 0 : i32
    %c0_i32_0 = arith.constant 0 : i32
    %c0_i32_1 = arith.constant 0 : i32
    return %c0_i32, %c0_i32_0 : i32, i32
  }
  func.func @transform_3(%arg0: i32, %arg1: i32) -> (i32, i32, i32) {
    %c0_i32 = arith.constant 0 : i32
    %c0_i32_0 = arith.constant 0 : i32
    %c0_i32_1 = arith.constant 0 : i32
    return %arg0, %c0_i32, %c0_i32_0 : i32, i32, i32
  }
}

</mosaic_0001>

<bundles_post_ra>
// kernel: tpu_custom_call.1
= control target key start
LH: loop header
LB: loop body
LE: loop exit
PB: predicated region body
PF: predicated region fallthrough
CT: control target
= control target key end

     0   :  { %8 = vsyncpa [#allocation4], 0  ;;  %s1352_s0 = inlined_call_operand.hbm [shape: f32[2,32,256], index: 0, kind: input, shape index: {}]   ;;  %s1353_s1 = inlined_call_operand.vmem [shape: f32[32,2], index: 1, kind: input, shape index: {}]   ;;  %s1354_s2 = inlined_call_operand.vmem [shape: f32[2,32], index: 2, kind: input, shape index: {}]   ;;  %s1355_s3 = inlined_call_operand.vmem [shape: f32[2,32,1], index: 3, kind: output, shape index: {}]  }
   0x1   :  { %10 = vsyncpa [#allocation4 + $0x1], 0  ;;  %s1117_s12 = smov 0   ;;  %s1119_s13 = smov 0  }
   0x2   :  { %s1121_s14 = smov 0   ;;  %s1123_s15 = smov 0  }
   0x3   :  { %s1125_s16 = smov 0   ;;  %s1127_s17 = smov 0  }
   0x4 LB: > { %s891_s18 = sadd.s32 4294967295, %s1087_s17   ;;  %s28_s19 = sadd.s32 1, %s1083_s16  ;;  %s1087_s17 = sphi %s1127_s17, %s16_s17   ;;  %s1083_s16 = sphi %s1125_s16, %s1363_s16   ;;  %s1079_s15 = sphi %s1123_s15, %s1362_s15   ;;  %s1075_s14 = sphi %s1121_s14, %s1361_s14   ;;  %s1071_s13 = sphi %s1119_s13, %s1360_s13   ;;  %s1067_s12 = sphi %s1117_s12, %s1359_s12  }
   0x5   : > { %p30_p0 = scmp.ge.s32.totalorder %s28_s19, 2  ;;  %s37_s20 = sadd.s32 1, %s1075_s14 }
   0x6   : > { %p44_p1 = scmp.ne.s32.totalorder %s1075_s14, %s1071_s13  ;;  %p45_p2 = scmp.eq.s32.totalorder %s1087_s17, 0 }
   0x7   : > { %s1365_s19 = smov (%p30_p0, %s28_s19), 0  ;;  %p50_p4 = scmp.ne.s32.totalorder %s1071_s13, %s1067_s12 }
   0x8   : > { %p1153_p3 = por %p45_p2, %p44_p1  ;;  %s32_s22 = ssub.s32 %s1083_s16, %s1365_s19 }
   0x9   : > { %p51_p5 = scmp.eq.s32.totalorder %s891_s18, 0  ;;  %p35_p6 = scmp.eq.s32.totalorder %s32_s22, 0 }
   0xa   : > { %p945_p8 = scmp.lt.s32.totalorder %s1087_s17, 2  ;;  %s148_s25 = sand.u32 1, %s1075_s14  }
   0xb   : > { %p1160_p7 = por %p51_p5, %p50_p4  ;;  %s908_s26 = sshll.u32 %s1083_s16, 10 }
   0xc   : > { %s1166_s24 = scalar_select %p35_p6, %s1075_s14, %s37_s20  }
   0xd   : > { %s895_s27 = sshll.u32 %s148_s25, 6  ;;  %s1173_s30 = scalar_lea.hbm %s1352_s0, %s908_s26 }
   0xe   : > { %s152_s4 = scalar_lea.vmem [#allocation3], %s895_s27  ;;  %p1177_p9 = pnand %p945_p8, %p1153_p3 }
   0xf   : > { %s161_s5 = sshll.u32 %s152_s4, 4  ;;  %s1183_s7 = scalar_lea.sflag [#allocation4], %s148_s25  ;;  %s1181_s5 = int_to_ptr.vmem [resolvable:$true] %s161_s5 }
  0x10   : > { %s1007_s8 = scalar_lea.hbm %s1173_s30, 1024  ;;  %p1009_p11 = pneg %p1177_p9 }
  0x11   : > { %p1008_p10 = scmp.ne.s32.totalorder %s1173_s30, %s1007_s8  ;;  %s1012_s11 = scalar_lea.hbm %s1352_s0, 2048 }
  0x12   : > { %p1013_p0 = scmp.lt.u32.totalorder %s1173_s30, %s1352_s0  ;;  %p1014_p1 = scmp.lt.u32.totalorder %s1012_s11, %s1007_s8 }
  0x13   : > { %p1010_p12 = pnand %p1009_p11, %p1008_p10  ;;  %p1016_p3 = scmp.lt.u32.totalorder %s1007_s8, %s1173_s30 }
  0x14   : > { %p1015_p2 = por %p1014_p1, %p1013_p0 }
  0x15   : > { %p1011_p13 = pneg %p1010_p12 }
  0x16   : > { %p1017_p4 = por %p1016_p3, %p1015_p2 }
  0x18   : > { %p1018_p5 = pnand %p1017_p4, %p1011_p13 }
  0x1a   : > { %1021 = shalt.err (!%p1018_p5)
}
  0x1b   : > { %s1022_s20 = scalar_lea.vmem %s1181_s5, 1024  ;;  %s1089_s21 = smov [#allocation3]  }
  0x1c   : > { %p1023_p6 = scmp.ne.s32.totalorder %s1181_s5, %s1022_s20  ;;  %s1027_s22 = sshll.u32 %s1089_s21, 4  ;;  %s1028_s22 = int_to_ptr.vmem [resolvable:$false] %s1027_s22 }
  0x1d   : > { %s1029_s25 = scalar_lea.vmem %s1028_s22, 2048  ;;  %p1030_p12 = scmp.lt.s32.totalorder %s1181_s5, %s1028_s22 }
  0x1e   : > { %p1025_p8 = pnand %p1023_p6, %p1009_p11  ;;  %p1031_p0 = scmp.lt.s32.totalorder %s1029_s25, %s1022_s20 }
  0x20   : > { %p1026_p10 = pneg %p1025_p8  ;;  %p1032_p1 = por %p1031_p0, %p1030_p12 }
  0x22   : > { %p1033_p2 = pnand %p1032_p1, %p1026_p10 }
  0x24   : > { %1036 = shalt.err (!%p1033_p2)
}
  0x25   : > { %s1090_s26 = smov 256   ;;  %s1091_s27 = smov 16  }
  0x26   : > { %944 = dma.hbm_to_vmem [thread:$0]  (!%p1177_p9), %s1173_s30, 1024, %s1181_s5, %s1183_s7, %s1090_s26, %s1090_s26, %s1091_s27  }
  0x27   : > { %p898_p11 = scmp.ge.s32.totalorder %s1087_s17, 1  ;;  %p169_p13 = scmp.lt.s32.totalorder %s1087_s17, 3 }
  0x29   : > { %p170_p3 = pnand %p898_p11, %p169_p13 }
  0x2a   : > { %s175_s28 = sand.u32 (!%p170_p3), 1, %s1071_s13  }
  0x2b   : > { %173 = sbr.rel (%p170_p3) target bundleno = 953 (0x3b9), region = 32  ;;  %s899_s29 = sshll.u32 (!%p170_p3), %s175_s28, 6 }
  0x2c   : > { %s176_s4 = scalar_lea.sflag (!%p170_p3), [#allocation4], %s175_s28  ;;  %s179_s8 = scalar_lea.vmem (!%p170_p3), [#allocation3], %s899_s29 }
  0x32   : > { %1062 = dma.done.wait (%p1160_p7), %s176_s4, 1024  }
  0x33   : > { %1064 = vsyncadd (%p1160_p7), %s176_s4, 4294966272  ;;  %v215_v0 = vld [vmem:[%s179_s8] sm:$0xff]  ;;  %v216_v1 = vld [vmem:[%s179_s8 + $0x8] sm:$0xff]  ;;  %v1092_v12 = vmov 0   ;;  %v239_v13 = vlaneseq  ;;  %v1093_v14 = vmov 1966171168  }
  0x34   : > { %v217_v2 = vld [vmem:[%s179_s8 + $0x10] sm:$0xff]  ;;  %v223_v3 = vadd.f32 %v216_v1, %v215_v0  ;;  %v218_v4 = vld [vmem:[%s179_s8 + $0x18] sm:$0xff]  ;;  %v219_v5 = vld [vmem:[%s179_s8 + $0x20] sm:$0xff]  ;;  %1001 = vset.pattern.permute.xlu0 %v1092_v12  ;;  %1002 = vset.pattern.permute.xlu1 %v1092_v12  ;;  %v372_v15 = vunpack.c.l.s4 %v1093_v14  ;;  %vm212_vm0 = vcmask 253952   ;;  %vm1096_vm1 = vmmov 0   ;;  %p203_p7 = scmp.lt.s32.totalorder %s1079_s15, 1 }
  0x35   : > { %v220_v6 = vld [vmem:[%s179_s8 + $0x28] sm:$0xff]  ;;  %v221_v8 = vld [vmem:[%s179_s8 + $0x30] sm:$0xff]  ;;  %v222_v9 = vld [vmem:[%s179_s8 + $0x38] sm:$0xff]  ;;  %v226_v10 = vadd.f32 %v218_v4, %v217_v2  ;;  %v1219_v16 = vshrl.u32 %v239_v13, 7  ;;  %vm586_vm2 = vcmask 130112   ;;  %vm593_vm3 = vcmask 195712  }
  0x36   : > { %v229_v7 = vadd.f32 %v220_v6, %v219_v5  ;;  %224 = vadd.xlane.f32.xlu0 %v223_v3  ;;  %v232_v11 = vadd.f32 %v222_v9, %v221_v8  ;;  %v373_v17 = vunpack.c.0.s8 %v372_v15  ;;  %vm600_vm4 = vcmask 261312   ;;  %s1367_s15 = smov (!%p203_p7, %s1079_s15), 1 }
  0x37   : > { %v1222_v18 = vsub.s32 0, %v1219_v16  ;;  %v1225_v19 = vsub.s32 1, %v1219_v16  ;;  %v1228_v20 = vsub.s32 2, %v1219_v16  ;;  %v1231_v21 = vsub.s32 3, %v1219_v16  ;;  %s909_s20 = sshll.u32 %s1367_s15, 5 }
  0x38   : > { %230 = vadd.xlane.f32.xlu1 %v229_v7  ;;  %v1234_v22 = vsub.s32 4, %v1219_v16  ;;  %v1237_v23 = vsub.s32 5, %v1219_v16  ;;  %v1240_v24 = vsub.s32 6, %v1219_v16  ;;  %v1243_v25 = vsub.s32 7, %v1219_v16  ;;  %s207_s25 = scalar_lea.vmem %s1355_s3, %s909_s20 }
  0x39   : > { %v1246_v27 = vsub.s32 %v373_v17, %v1219_v16  ;;  %vm629_vm5 = vcmask 261120   ;;  %vm709_vm6 = vcmask 1041408   ;;  %vm705_vm7 = vcmask 15360  }
  0x3a   : > { %227 = vadd.xlane.f32.xlu0 %v226_v10  ;;  %vm808_vm8 = vcmask 7168  }
  0x3c   : > { %233 = vadd.xlane.f32.xlu1 %v232_v11 }
  0xc3   : > { %v225_v26 = vpop.xlane.xlu0 %224 }
  0xc4   : > { %v242_v29 = vrot.slane %v225_v26, %v1222_v18  ;;  %v246_v30 = vrot.slane %v225_v26, %v1225_v19  ;;  %v250_v31 = vrot.slane %v225_v26, %v1228_v20  ;;  %v254_v32 = vrot.slane %v225_v26, %v1231_v21 }
  0xc5   : > { %v231_v28 = vpop.xlane.xlu1 %230  ;;  %v258_v33 = vrot.slane %v225_v26, %v1234_v22  ;;  %v262_v34 = vrot.slane %v225_v26, %v1237_v23  ;;  %v266_v35 = vrot.slane %v225_v26, %v1240_v24  ;;  %v270_v36 = vrot.slane %v225_v26, %v1243_v25 }
  0xc6   : > { %v367_v37 = vcombine.low %v242_v29, %v246_v30  ;;  %v368_v38 = vcombine.low %v250_v31, %v254_v32  ;;  %v306_v39 = vrot.slane %v231_v28, %v1222_v18  ;;  %v310_v40 = vrot.slane %v231_v28, %v1225_v19 }
  0xc7   : > { %v228_v41 = vpop.xlane.xlu0 %227  ;;  %v369_v42 = vcombine.low %v258_v33, %v262_v34  ;;  %v370_v43 = vcombine.low %v266_v35, %v270_v36  ;;  %v314_v44 = vrot.slane %v231_v28, %v1228_v20  ;;  %v318_v45 = vrot.slane %v231_v28, %v1231_v21 }
  0xc8   : > { %v377_v46 = vrot.slane %v367_v37, %v1246_v27  ;;  %v384_v47 = vrot.slane %v368_v38, %v1246_v27  ;;  %v274_v48 = vrot.slane %v228_v41, %v1222_v18  ;;  %v278_v49 = vrot.slane %v228_v41, %v1225_v19 }
  0xc9   : > { %v391_v50 = vrot.slane %v369_v42, %v1246_v27  ;;  %v398_v51 = vrot.slane %v370_v43, %v1246_v27  ;;  %v282_v52 = vrot.slane %v228_v41, %v1228_v20  ;;  %v286_v53 = vrot.slane %v228_v41, %v1231_v21  ;;  %v234_v2 = vpop.xlane.xlu1 %233 }
  0xca   : > { %v399_v54 = vcombine.low %v377_v46, %v384_v47  ;;  %v290_v55 = vrot.slane %v228_v41, %v1234_v22  ;;  %v294_v56 = vrot.slane %v228_v41, %v1237_v23  ;;  %v298_v57 = vrot.slane %v228_v41, %v1240_v24 }
  0xcb   : > { %v400_v58 = vcombine.low %v391_v50, %v398_v51  ;;  %v302_v59 = vrot.slane %v228_v41, %v1243_v25  ;;  %v416_v60 = vcombine.low %v274_v48, %v278_v49  ;;  %v417_v61 = vcombine.low %v282_v52, %v286_v53 }
  0xcc   : > { %v407_v62 = vrot.slane %v399_v54, %v1246_v27  ;;  %v418_v63 = vcombine.low %v290_v55, %v294_v56  ;;  %v322_v0 = vrot.slane %v231_v28, %v1234_v22  ;;  %v326_v1 = vrot.slane %v231_v28, %v1237_v23  ;;  %v625_v56 = vld [vmem:[%s1353_s1] sm:$0xff] }
  0xcd   : > { %v414_v3 = vrot.slane %v400_v58, %v1246_v27  ;;  %v419_v4 = vcombine.low %v298_v57, %v302_v59  ;;  %v426_v5 = vrot.slane %v416_v60, %v1246_v27  ;;  %v433_v6 = vrot.slane %v417_v61, %v1246_v27  ;;  %v626_v57 = vld [vmem:[%s1353_s1 + $0x8] sm:$0xff]  ;;  %v627_v58 = vld [vmem:[%s1353_s1 + $0x10] sm:$0xff]  ;;  %v628_v61 = vld [vmem:[%s1353_s1 + $0x18] sm:$0xff] }
  0xce   : > { %v440_v7 = vrot.slane %v418_v63, %v1246_v27  ;;  %v330_v8 = vrot.slane %v231_v28, %v1240_v24  ;;  %v334_v9 = vrot.slane %v231_v28, %v1243_v25  ;;  %v465_v10 = vcombine.low %v306_v39, %v310_v40 }
  0xcf   : > { %v415_v11 = vcombine.low %v407_v62, %v414_v3  ;;  %v447_v12 = vrot.slane %v419_v4, %v1246_v27  ;;  %v448_v14 = vcombine.low %v426_v5, %v433_v6  ;;  %v466_v15 = vcombine.low %v314_v44, %v318_v45 }
  0xd0   : > { %v467_v17 = vcombine.low %v322_v0, %v326_v1  ;;  %v468_v26 = vcombine.low %v330_v8, %v334_v9  ;;  %v475_v29 = vrot.slane %v465_v10, %v1246_v27  ;;  %v338_v30 = vrot.slane %v234_v2, %v1222_v18 }
  0xd1   : > { %564 = vperm.xlu0 %1001, %v415_v11   ;;  %v449_v31 = vcombine.low %v440_v7, %v447_v12  ;;  %v456_v32 = vrot.slane %v448_v14, %v1246_v27  ;;  %v482_v33 = vrot.slane %v466_v15, %v1246_v27  ;;  %v342_v28 = vrot.slane %v234_v2, %v1225_v19 }
  0xd2   : > { %v489_v34 = vrot.slane %v467_v17, %v1246_v27  ;;  %v496_v35 = vrot.slane %v468_v26, %v1246_v27  ;;  %v346_v36 = vrot.slane %v234_v2, %v1228_v20  ;;  %v350_v37 = vrot.slane %v234_v2, %v1231_v21 }
  0xd3   : > { %v463_v38 = vrot.slane %v449_v31, %v1246_v27  ;;  %v497_v39 = vcombine.low %v475_v29, %v482_v33  ;;  %v354_v40 = vrot.slane %v234_v2, %v1234_v22  ;;  %v358_v41 = vrot.slane %v234_v2, %v1237_v23 }
  0xd4   : > { %v498_v42 = vcombine.low %v489_v34, %v496_v35  ;;  %v362_v43 = vrot.slane %v234_v2, %v1240_v24  ;;  %v366_v19 = vrot.slane %v234_v2, %v1243_v25  ;;  %v514_v44 = vcombine.low %v338_v30, %v342_v28  ;;  %v704_v28 = vld [vmem:[%s1354_s2] sm:$0x3] }
  0xd5   : > { %v464_v45 = vcombine.low %v456_v32, %v463_v38  ;;  %v505_v46 = vrot.slane %v497_v39, %v1246_v27  ;;  %v515_v47 = vcombine.low %v346_v36, %v350_v37  ;;  %v516_v20 = vcombine.low %v354_v40, %v358_v41 }
  0xd6   : > { %v512_v21 = vrot.slane %v498_v42, %v1246_v27  ;;  %v517_v48 = vcombine.low %v362_v43, %v366_v19  ;;  %v524_v49 = vrot.slane %v514_v44, %v1246_v27  ;;  %v1094_v55 = vmov 0.0  }
  0xd7   : > { %567 = vperm.xlu1 %1002, %v464_v45   ;;  %v531_v22 = vrot.slane %v515_v47, %v1246_v27  ;;  %v538_v23 = vrot.slane %v516_v20, %v1246_v27  ;;  %213 = vst.msk [vmem:[#allocation2] sm:$0x1] %vm212_vm0, %v1094_v55  ;;  %928 = vmatprep.subr.mxu1 %v1094_v55  ;;  %v1095_v59 = vmov 0.0|0.0   ;;  %v576_v63 = vand.u32 127, %v239_v13 }
  0xd8   : > { %v513_v50 = vcombine.low %v505_v46, %v512_v21  ;;  %v545_v24 = vrot.slane %v517_v48, %v1246_v27  ;;  %933 = vmatprep.subr.bf16.mxu0 %v1095_v59  ;;  %v934_v60 = vpack.c.bf16 %v626_v57, %v625_v56  ;;  %v937_v62 = vpack.c.bf16 %v628_v61, %v627_v58 }
  0xd9   : > { %v546_v25 = vcombine.low %v524_v49, %v531_v22  ;;  %925 = vmatprep.mubr.msk.f32.mxu0 %vm1096_vm1, %v1094_v55  ;;  %930 = vmatprep.mubr.msk.f32.mxu1 %vm1096_vm1, %v1094_v55  ;;  %v581_v0 = vadd.s32 4294967288, %v576_v63  ;;  %v588_v1 = vadd.s32 4294967280, %v576_v63  ;;  %v595_v4 = vadd.s32 4294967272, %v576_v63 }
  0xda   : > { %v547_v51 = vcombine.low %v538_v23, %v545_v24  ;;  %935 = vmatpush3.bf16.msra.mxu0 %v934_v60  ;;  %v579_v6 = vsub.s32 %v576_v63, %v1219_v16  ;;  %929 = vmatpush3.msk.msra.mxu1 %vm709_vm6, %v704_v28 }
  0xdb   : > { %570 = vperm.xlu1 %1002, %v513_v50   ;;  %v554_v52 = vrot.slane %v546_v25, %v1246_v27  ;;  %936 = vmatprep.subr.bf16.mxu0 %v1095_v59  ;;  %v584_v3 = vsub.s32 %v581_v0, %v1219_v16  ;;  %v591_v5 = vsub.s32 %v588_v1, %v1219_v16 }
  0xdc   : > { %v561_v53 = vrot.slane %v547_v51, %v1246_v27  ;;  %v598_v10 = vsub.s32 %v595_v4, %v1219_v16 }
  0xde   : > { %v562_v54 = vcombine.low %v554_v52, %v561_v53  ;;  %938 = vmatpush3.bf16.msra.mxu0 %v937_v62  ;;  %v214_v30 = vld [vmem:[#allocation2] sm:$0x1] }
  0xe0   : > { %573 = vperm.xlu1 %1002, %v562_v54  }
 0x150   : > { %v565_v8 = vpop.permute.xlu0 %564 }
 0x151   : > { %v580_v12 = vrot.slane %v565_v8, %v579_v6 }
 0x156   : > { %v568_v2 = vpop.permute.xlu1 %567 }
 0x157   : > { %v585_v9 = vrot.slane %v568_v2, %v584_v3 }
 0x159   : > { %v587_v14 = vsel %vm586_vm2, %v585_v9, %v580_v12 }
 0x15a   : > { %v571_v7 = vpop.permute.xlu1 %570 }
 0x15b   : > { %v592_v11 = vrot.slane %v571_v7, %v591_v5 }
 0x15d   : > { %v594_v17 = vsel %vm593_vm3, %v592_v11, %v587_v14 }
 0x15f   : > { %v574_v13 = vpop.permute.xlu1 %573 }
 0x160   : > { %v599_v15 = vrot.slane %v574_v13, %v598_v10 }
 0x162   : > { %v601_v26 = vsel %vm600_vm4, %v599_v15, %v594_v17 }
 0x163   : > { %v608_v29 = vrot.slane %v601_v26, %v1246_v27 }
 0x165   : > { %v615_v31 = vrot.slane %v608_v29, %v1246_v27 }
 0x167   : > { %v617_v32 = vadd.f32 %v615_v31, %v214_v30 }
 0x169   : > { %619 = vst.msk [vmem:[#allocation2] sm:$0x1] %vm212_vm0, %v617_v32 }
 0x170   : > { %v623_v33 = vld [vmem:[#allocation2] sm:$0x1] }
 0x171   : > { %v624_v16 = vmul.f32 0.00390625, %v623_v33 }
 0x173   : > { %926 = vmatmul.mubr.msk.f32.vlgmr.msra.gmra.mrb[0].mxu0 %vm629_vm5, %v624_v16 }
 0x246   : > { %v699_v34 = vpop.f32.mrb[0].mxu0 }
 0x247   : > { %v703_v35 = vmax.f32 %v699_v34, 0.0  ;;  %v927_v36 = vpop.f32.mrb[1].mxu0 }
 0x249   : > { %931 = vmatmul.mubr.msk.f32.vlgmr.msra.gmra.mrb[0].mxu1 %vm705_vm7, %v703_v35 }
 0x31c   : > { %v779_v27 = vpop.f32.mrb[0].mxu1 }
 0x31d   : > { %v905_v37 = vmul.f32 -1.442695, %v779_v27  ;;  %v932_v38 = vpop.f32.mrb[1].mxu1 }
 0x31f   : > { %1003 = vpow2.f32 %v905_v37 }
 0x329   : > { %v1004_v39 = vpop.eup %1003 }
 0x32a   : > { %v786_v40 = vadd.f32 1.0, %v1004_v39 }
 0x32c   : > { %1005 = vrcp.f32 %v786_v40 }
 0x336   : > { %v1006_v41 = vpop.eup %1005 }
 0x337   : > { %v792_v42 = vrot.slane %v1006_v41, %v1222_v18 }
 0x339   : > { %794 = vbcast.lane.b32.xlu1 %v792_v42, 256 }
 0x33d   : > { %798 = vbcast.lane.b32.xlu1 %v792_v42, 264 }
 0x341   : > { %802 = vbcast.lane.b32.xlu1 %v792_v42, 272 }
 0x345   : > { %806 = vbcast.lane.b32.xlu1 %v792_v42, 280 }
 0x3ab   : > { %v795_v43 = vpop.permute.xlu1 %794 }
 0x3ac   : > { %809 = vst.msk [vmem:[%s207_s25] sm:$0xff] %vm808_vm8, %v795_v43 }
 0x3af   : > { %v799_v19 = vpop.permute.xlu1 %798 }
 0x3b0   : > { %810 = vst.msk [vmem:[%s207_s25 + $0x8] sm:$0xff] %vm808_vm8, %v799_v19 }
 0x3b3   : > { %v803_v44 = vpop.permute.xlu1 %802 }
 0x3b4   : > { %811 = vst.msk [vmem:[%s207_s25 + $0x10] sm:$0xff] %vm808_vm8, %v803_v44 }
 0x3b7   : > { %v807_v45 = vpop.permute.xlu1 %806 }
 0x3b8   : > { %812 = vst.msk [vmem:[%s207_s25 + $0x18] sm:$0xff] %vm808_vm8, %v807_v45 }
 0x3b9 PF: > { %s16_s17 = sadd.s32 1, %s1087_s17   ;;  %s1359_s12 = smov %s1071_s13 }
 0x3ba   : > { %p13_p9 = scmp.ge.s32.totalorder %s16_s17, 4   ;;  %s1360_s13 = smov %s1075_s14 }
 0x3bb   : > { %s1361_s14 = smov %s1166_s24  ;;  %s1362_s15 = smov %s1083_s16 }
 0x3bc   : > { %s1363_s16 = smov %s1365_s19  ;;  %15 = sbr.rel (!%p13_p9) target bundleno = 4 (0x4), region = 80 }
 0x3c3   :  { %834 = vsyncpa [#allocation4], 1 }
 0x3c4   :  { %836 = vsyncpa [#allocation4 + $0x1], 1 }

</bundles_post_ra>
